<compile_context>
chip_gen: v5e
topology: v5e:2x2
jax: 0.10.0
libtpu: 0.0.40
codegen_flags: <defaults>
</compile_context>

<pallas_src>
import jax
import jax.numpy as jnp
import numpy as np
from jax import lax
from jax.experimental import pallas as pl
from jax.experimental.pallas import tpu as pltpu

NUM_BINS = 10
LANES = 128
SUBLANES = 8
MAX_TILE_R = 2048                 # 2048 x 128 f32 = 1 MiB per stream per block
CHUNK_CANDIDATES = (64, 32, 16, 8)


def update_ema(ema, alpha, num_bins, hist):
    hist = hist / (jnp.sum(hist) + 1e-10) * num_bins
    ema = ema * alpha + (1.0 - alpha) * hist
    ema = ema / (jnp.sum(ema) + 1e-10) * num_bins
    return ema


def _make_kernel(num_bins, label_smoothing, has_mask, chunk_r, n_chunks,
                 num_blocks, bpc, guard_dead):
    # torch hard-codes .clamp(0, 9); gm >= 0 so no lower clamp is needed.
    clamp_max = float(min(num_bins - 1, 9))

    def kernel(*refs):
        if has_mask:
            pred_ref, targ_ref, mask_ref, inv_ref, loss_ref, hist_ref = refs
        else:
            pred_ref, targ_ref, inv_ref, loss_ref, hist_ref = refs
            mask_ref = None

        # Per-core resident accumulators: zero on that core's first inner step.
        @pl.when(pl.program_id(1) == 0)
        def _init():
            loss_ref[...] = jnp.zeros_like(loss_ref)
            hist_ref[...] = jnp.zeros_like(hist_ref)

        if chunk_r >= 64:
            # Offload the axis-0 reduction to the otherwise-idle MXU.
            # Hoisted once: JAX does not CSE broadcast_in_dim.
            ones_lhs = jnp.ones((SUBLANES, chunk_r), jnp.float32)

            def colsum(x):                       # (chunk_r, 128) -> (8, 128)
                return jnp.dot(ones_lhs, x, preferred_element_type=jnp.float32)
        else:
            def colsum(x):                       # tiny chunks: plain vreg adds
                acc = x[0:SUBLANES, :]
                for s in range(1, chunk_r // SUBLANES):
                    acc = acc + x[s * SUBLANES:(s + 1) * SUBLANES, :]
                return acc

        def process_chunk(c, carry):
            r0 = pl.multiple_of(c * chunk_r, chunk_r)
            p = pred_ref[pl.ds(r0, chunk_r), :]
            t = targ_ref[pl.ds(r0, chunk_r), :]
            if label_smoothing > 0.0:
                t = jnp.clip(t, label_smoothing, 1.0 - label_smoothing)

            # nn.BCELoss(reduction='none'); torch clamps log() at -100.
            log_p = jnp.maximum(jnp.log(p), -100.0)
            log_1mp = jnp.maximum(jnp.log(1.0 - p), -100.0)
            raw = -(t * log_p + (1.0 - t) * log_1mp)

            gm = jnp.abs(p - t)
            idx_f = jnp.minimum(jnp.floor(gm * num_bins), clamp_max)

            if has_mask:
                m = mask_ref[pl.ds(r0, chunk_r), :]
                rm = raw * m
            else:
                m = None
                rm = raw

            # One compare per bin feeds both the weight gather (SMEM scalar
            # select) and the mask-weighted histogram partial.
            w = jnp.zeros_like(p)
            for b in range(num_bins):
                sel = idx_f == float(b)
                w = jnp.where(sel, inv_ref[b], w)
                hsrc = (jnp.where(sel, m, 0.0) if has_mask
                        else jnp.where(sel, 1.0, 0.0))
                hist_ref[0, b] += colsum(hsrc)
            loss_ref[0] += colsum(rm * w)
            return carry

        def run_tile():
            lax.fori_loop(0, n_chunks, process_chunk, 0)

        if guard_dead:
            blk = pl.program_id(0) * bpc + pl.program_id(1)
            pl.when(blk < num_blocks)(run_tile)
        else:
            run_tile()

    return kernel


def _best_tile(rows):
    for cand in range(min(MAX_TILE_R, rows), SUBLANES - 1, -SUBLANES):
        if rows % cand == 0:
            return cand
    return SUBLANES


def bce_ghm_loss(pred, target, mask=None, *, gd_stat_ema,
                 num_bins=NUM_BINS, alpha=1.0 - 1e-6, label_smoothing=0.0,
                 valid=False):
    """Functional BCEGHMLoss.forward: returns (loss_final, new_GD_stat_ema)."""
    if pred.size == 0:
        return jnp.float32(0.0), gd_stat_ema
    has_mask = mask is not None
    if has_mask:
        assert pred.shape == target.shape and pred.shape[:2] == mask.shape[:2]
        if mask.ndim < pred.ndim:
            # TODO(synk): stream the low-rank (N, C) mask as per-row scalars
            # instead of materialising a full-size HBM broadcast copy.
            mask = jnp.broadcast_to(mask[..., None], pred.shape)
    else:
        assert pred.shape == target.shape
    # TODO(synk): torch runtime asserts (pred/target in [0, 1]) not replicated;
    # NaN inputs match no bin and are silently dropped instead of propagating.

    total = int(pred.size)
    rows = pl.cdiv(pl.cdiv(total, LANES), SUBLANES) * SUBLANES
    tile_r = _best_tile(rows)
    if tile_r < 256 and rows > 256:
        # Awkward row counts: round up so big, evenly-dividing tiles exist.
        rows = pl.cdiv(rows, 256) * 256
        tile_r = _best_tile(rows)
    pad = rows * LANES - total

    def flat(x, fill):
        # TODO(synk): stream native (e.g. bf16) inputs and upcast in-kernel to
        # halve HBM traffic on mem-bound chips.
        x = x.reshape(-1).astype(jnp.float32)
        if pad:
            x = jnp.pad(x, (0, pad), constant_values=fill)
        return x.reshape(rows, LANES)

    operands = [flat(pred, 0.5), flat(target, 0.5)]   # 0.5 keeps logs finite
    if has_mask:
        operands.append(flat(mask, 0.0))

    # weights = 1 / GD_stat_ema[idx] + 0.001, folded into one SMEM table.
    inv_ema = (1.0 / gd_stat_ema.astype(jnp.float32) + 0.001).reshape(num_bins)
    operands.append(inv_ema)

    num_blocks = rows // tile_r
    # Two-way outer split for multi-TensorCore chips (v7x); on 1-TC chips the
    # extra axis is near-free bookkeeping.
    ncores = 2 if num_blocks >= 2 else 1
    bpc = int(pl.cdiv(num_blocks, ncores))
    guard_dead = (ncores * bpc != num_blocks)
    chunk_r = next(c for c in CHUNK_CANDIDATES if tile_r % c == 0)
    n_chunks = tile_r // chunk_r

    if guard_dead:
        row_map = lambda c, i: (jnp.minimum(c * bpc + i, num_blocks - 1), 0)
    else:
        row_map = lambda c, i: (c * bpc + i, 0)

    data_spec = pl.BlockSpec((tile_r, LANES), row_map)
    in_specs = [data_spec, data_spec]
    if has_mask:
        in_specs.append(data_spec)
    in_specs.append(pl.BlockSpec(memory_space=pltpu.MemorySpace.SMEM))

    kernel = _make_kernel(num_bins, float(label_smoothing), has_mask, chunk_r,
                          n_chunks, num_blocks, bpc, guard_dead)

    n_streams = 3 if has_mask else 2
    tile_bytes = tile_r * LANES * 4
    vmem_limit = int(min(48 << 20,
                         max(32 << 20, 4 * n_streams * tile_bytes + (8 << 20))))

    loss_acc, hist_acc = pl.pallas_call(
        kernel,
        out_shape=(
            jax.ShapeDtypeStruct((ncores, SUBLANES, LANES), jnp.float32),
            jax.ShapeDtypeStruct((ncores, num_bins, SUBLANES, LANES),
                                 jnp.float32),
        ),
        grid=(ncores, bpc),
        in_specs=in_specs,
        out_specs=(
            pl.BlockSpec((1, SUBLANES, LANES), lambda c, i: (c, 0, 0)),
            pl.BlockSpec((1, num_bins, SUBLANES, LANES),
                         lambda c, i: (c, 0, 0, 0)),
        ),
        compiler_params=pltpu.CompilerParams(
            dimension_semantics=("parallel", "arbitrary"),
            vmem_limit_bytes=vmem_limit),
    )(*operands)

    hist = jnp.sum(hist_acc, axis=(0, 2, 3))            # (num_bins,)
    loss_sum = jnp.sum(loss_acc)
    if pad and not has_mask:
        # Padded elements (p = t = 0.5) fall in bin 0 with weight inv_ema[0]
        # and raw loss log(2); subtract their contribution analytically.
        loss_sum = loss_sum - jnp.float32(pad) * jnp.float32(np.log(2.0)) * inv_ema[0]
        hist = hist.at[0].add(-jnp.float32(pad))

    # Bins partition the valid elements, so sum(hist) == sum(mask).
    loss_final = loss_sum / jnp.sum(hist)
    if valid:
        return loss_final, gd_stat_ema
    new_ema = update_ema(gd_stat_ema.astype(jnp.float32), alpha, num_bins, hist)
    return loss_final, new_ema


def bce_ghm_loss_ref(pred, target, mask, gd_stat_ema,
                     num_bins=NUM_BINS, alpha=1.0 - 1e-6, label_smoothing=0.0,
                     valid=False):
    """Pure-JAX reference mirroring the PyTorch module."""
    if mask is None:
        mask = jnp.ones_like(pred)
    if mask.ndim < pred.ndim:
        mask = jnp.broadcast_to(mask[..., None], pred.shape)
    t = jnp.clip(target, label_smoothing, 1.0 - label_smoothing)
    log_p = jnp.maximum(jnp.log(pred), -100.0)
    log_1mp = jnp.maximum(jnp.log(1.0 - pred), -100.0)
    raw = -(t * log_p + (1.0 - t) * log_1mp)
    gm = jnp.abs(pred - t)
    idx = jnp.clip(jnp.floor(gm * num_bins), 0.0, 9.0).astype(jnp.int32)
    w = 1.0 / gd_stat_ema[idx] + 0.001
    lw = raw * w * mask
    loss = jnp.sum(lw) / jnp.sum(mask)
    if valid:
        return loss, gd_stat_ema
    hist = jnp.zeros((num_bins,), jnp.float32).at[idx.reshape(-1)].add(
        mask.reshape(-1).astype(jnp.float32))
    return loss, update_ema(gd_stat_ema, alpha, num_bins, hist)


if __name__ == "__main__":
    key = jax.random.PRNGKey(0)
    k1, k2, k3 = jax.random.split(key, 3)
    shape = (2, 4, 16, 16)  # NCHW
    pred = jax.random.uniform(k1, shape, jnp.float32,
                              minval=1e-4, maxval=1.0 - 1e-4)
    target = jax.random.uniform(k2, shape, jnp.float32, minval=0.0, maxval=1.0)
    mask = (jax.random.uniform(k3, shape) > 0.25).astype(jnp.float32)
    # register_buffer('GD_stat_ema', torch.ones(num_bins)) -> deterministic init
    gd_stat_ema = jnp.ones((NUM_BINS,), jnp.float32)

    loss, new_ema = bce_ghm_loss(pred, target, mask, gd_stat_ema=gd_stat_ema)
    jax.block_until_ready((loss, new_ema))

    ref_loss, ref_ema = bce_ghm_loss_ref(pred, target, mask, gd_stat_ema)
    np.testing.assert_allclose(float(loss), float(ref_loss),
                               rtol=5e-5, atol=5e-5)
    np.testing.assert_allclose(np.asarray(new_ema), np.asarray(ref_ema),
                               rtol=1e-5, atol=1e-6)
    print("KERNEL_OK")
</pallas_src>

<mosaic_0001>
module attributes {stable_mosaic.version = 11 : i64} {
  func.func @kernel(%arg0: i32, %arg1: i32, %arg2: memref<16x128xf32, #tpu.memory_space<vmem>>, %arg3: memref<16x128xf32, #tpu.memory_space<vmem>>, %arg4: memref<16x128xf32, #tpu.memory_space<vmem>>, %arg5: memref<10xf32, #tpu.memory_space<smem>>, %arg6: memref<1x8x128xf32, #tpu.memory_space<vmem>>, %arg7: memref<1x10x8x128xf32, #tpu.memory_space<vmem>>) attributes {dimension_semantics = [#tpu.dimension_semantics<parallel>, #tpu.dimension_semantics<arbitrary>], iteration_bounds = array<i64: 1, 1>, scalar_prefetch = 0 : i64, scratch_operands = 0 : i64, tpu.core_type = #tpu.core_type<tc>, window_params = [{transform_indices = @transform_0, window_bounds = array<i64: 16, 128>}, {transform_indices = @transform_1, window_bounds = array<i64: 16, 128>}, {transform_indices = @transform_2, window_bounds = array<i64: 16, 128>}, {transform_indices = @transform_3, window_bounds = array<i64: 10>}, {transform_indices = @transform_4, window_bounds = array<i64: 1, 8, 128>}, {transform_indices = @transform_5, window_bounds = array<i64: 1, 10, 8, 128>}]} {
    %c0_i32 = arith.constant 0 : i32
    %0 = arith.cmpi eq, %arg1, %c0_i32 : i32
    %1 = arith.extui %0 : i1 to i32
    %c0_i32_0 = arith.constant 0 : i32
    %2 = arith.cmpi ne, %1, %c0_i32_0 : i32
    scf.if %2 {
      %cst_118 = arith.constant 0.000000e+00 : f32
      %205 = vector.broadcast %cst_118 : f32 to vector<1x8x128xf32>
      %c0_119 = arith.constant 0 : index
      %c0_120 = arith.constant 0 : index
      %c0_121 = arith.constant 0 : index
      %206 = vector.load %arg6[%c0_119, %c0_120, %c0_121] : memref<1x8x128xf32, #tpu.memory_space<vmem>>, vector<1x8x128xf32>
      tpu.vector_store %arg6[%c0_119, %c0_120, %c0_121], %205 {strides = array<i32>} : memref<1x8x128xf32, #tpu.memory_space<vmem>>, vector<1x8x128xf32>,
      %cst_122 = arith.constant 0.000000e+00 : f32
      %207 = vector.broadcast %cst_122 : f32 to vector<1x10x8x128xf32>
      %c0_123 = arith.constant 0 : index
      %c0_124 = arith.constant 0 : index
      %c0_125 = arith.constant 0 : index
      %c0_126 = arith.constant 0 : index
      %208 = vector.load %arg7[%c0_123, %c0_124, %c0_125, %c0_126] : memref<1x10x8x128xf32, #tpu.memory_space<vmem>>, vector<1x10x8x128xf32>
      tpu.vector_store %arg7[%c0_123, %c0_124, %c0_125, %c0_126], %207 {strides = array<i32>} : memref<1x10x8x128xf32, #tpu.memory_space<vmem>>, vector<1x10x8x128xf32>,
    } else {
    }
    %c0_i32_1 = arith.constant 0 : i32
    %c16_i32 = arith.constant 16 : i32
    %3 = arith.muli %c0_i32_1, %c16_i32 : i32
    %4 = tpu.assume_multiple %3, 16 : i32
    %5 = arith.index_cast %4 : i32 to index
    %c0 = arith.constant 0 : index
    %6 = vector.load %arg2[%5, %c0] : memref<16x128xf32, #tpu.memory_space<vmem>>, vector<16x128xf32>
    %7 = arith.index_cast %4 : i32 to index
    %c0_2 = arith.constant 0 : index
    %8 = vector.load %arg3[%7, %c0_2] : memref<16x128xf32, #tpu.memory_space<vmem>>, vector<16x128xf32>
    %9 = math.log %6 : vector<16x128xf32>
    %cst = arith.constant -1.000000e+02 : f32
    %10 = vector.broadcast %cst : f32 to vector<16x128xf32>
    %11 = arith.maximumf %9, %10 : vector<16x128xf32>
    %cst_3 = arith.constant 1.000000e+00 : f32
    %12 = vector.broadcast %cst_3 : f32 to vector<16x128xf32>
    %13 = arith.subf %12, %6 : vector<16x128xf32>
    %14 = math.log %13 : vector<16x128xf32>
    %cst_4 = arith.constant -1.000000e+02 : f32
    %15 = vector.broadcast %cst_4 : f32 to vector<16x128xf32>
    %16 = arith.maximumf %14, %15 : vector<16x128xf32>
    %17 = arith.mulf %8, %11 : vector<16x128xf32>
    %cst_5 = arith.constant 1.000000e+00 : f32
    %18 = vector.broadcast %cst_5 : f32 to vector<16x128xf32>
    %19 = arith.subf %18, %8 : vector<16x128xf32>
    %20 = arith.mulf %19, %16 : vector<16x128xf32>
    %21 = arith.addf %17, %20 : vector<16x128xf32>
    %cst_6 = arith.constant 0.000000e+00 : f32
    %22 = vector.broadcast %cst_6 : f32 to vector<16x128xf32>
    %23 = arith.subf %22, %21 : vector<16x128xf32>
    %24 = arith.subf %6, %8 : vector<16x128xf32>
    %25 = math.absf %24 : vector<16x128xf32>
    %cst_7 = arith.constant 1.000000e+01 : f32
    %26 = vector.broadcast %cst_7 : f32 to vector<16x128xf32>
    %27 = arith.mulf %25, %26 : vector<16x128xf32>
    %28 = math.floor %27 : vector<16x128xf32>
    %cst_8 = arith.constant 9.000000e+00 : f32
    %29 = vector.broadcast %cst_8 : f32 to vector<16x128xf32>
    %30 = arith.minimumf %28, %29 : vector<16x128xf32>
    %31 = arith.index_cast %4 : i32 to index
    %c0_9 = arith.constant 0 : index
    %32 = vector.load %arg4[%31, %c0_9] : memref<16x128xf32, #tpu.memory_space<vmem>>, vector<16x128xf32>
    %33 = arith.mulf %23, %32 : vector<16x128xf32>
    %cst_10 = arith.constant 0.000000e+00 : f32
    %34 = vector.broadcast %cst_10 : f32 to vector<16x128xf32>
    %cst_11 = arith.constant 0.000000e+00 : f32
    %35 = vector.broadcast %cst_11 : f32 to vector<16x128xf32>
    %36 = arith.cmpf oeq, %30, %35 : vector<16x128xf32>
    %c0_12 = arith.constant 0 : index
    %37 = memref.load %arg5[%c0_12] : memref<10xf32, #tpu.memory_space<smem>>
    %38 = vector.broadcast %37 : f32 to vector<16x128xf32>
    %39 = arith.select %36, %38, %34 : vector<16x128xi1>, vector<16x128xf32>
    %cst_13 = arith.constant 0.000000e+00 : f32
    %40 = vector.broadcast %cst_13 : f32 to vector<16x128xf32>
    %41 = arith.select %36, %32, %40 : vector<16x128xi1>, vector<16x128xf32>
    %c0_14 = arith.constant 0 : index
    %c0_15 = arith.constant 0 : index
    %c0_16 = arith.constant 0 : index
    %c0_17 = arith.constant 0 : index
    %42 = vector.load %arg7[%c0_14, %c0_15, %c0_16, %c0_17] : memref<1x10x8x128xf32, #tpu.memory_space<vmem>>, vector<1x1x8x128xf32>
    %43 = vector.shape_cast %42 : vector<1x1x8x128xf32> to vector<8x128xf32>
    %44 = vector.extract_strided_slice %41 {offsets = [0, 0], sizes = [8, 128], strides = [1, 1]} : vector<16x128xf32> to vector<8x128xf32>
    %45 = vector.extract_strided_slice %41 {offsets = [8, 0], sizes = [8, 128], strides = [1, 1]} : vector<16x128xf32> to vector<8x128xf32>
    %46 = arith.addf %44, %45 : vector<8x128xf32>
    %47 = arith.addf %43, %46 : vector<8x128xf32>
    %c0_18 = arith.constant 0 : index
    %c0_19 = arith.constant 0 : index
    %c0_20 = arith.constant 0 : index
    %c0_21 = arith.constant 0 : index
    %48 = vector.load %arg7[%c0_18, %c0_19, %c0_20, %c0_21] : memref<1x10x8x128xf32, #tpu.memory_space<vmem>>, vector<1x1x8x128xf32>
    %49 = vector.shape_cast %48 : vector<1x1x8x128xf32> to vector<8x128xf32>
    %50 = vector.shape_cast %47 : vector<8x128xf32> to vector<1x1x8x128xf32>
    tpu.vector_store %arg7[%c0_18, %c0_19, %c0_20, %c0_21], %50 {strides = array<i32>} : memref<1x10x8x128xf32, #tpu.memory_space<vmem>>, vector<1x1x8x128xf32>,
    %cst_22 = arith.constant 1.000000e+00 : f32
    %51 = vector.broadcast %cst_22 : f32 to vector<16x128xf32>
    %52 = arith.cmpf oeq, %30, %51 : vector<16x128xf32>
    %c1 = arith.constant 1 : index
    %53 = memref.load %arg5[%c1] : memref<10xf32, #tpu.memory_space<smem>>
    %54 = vector.broadcast %53 : f32 to vector<16x128xf32>
    %55 = arith.select %52, %54, %39 : vector<16x128xi1>, vector<16x128xf32>
    %cst_23 = arith.constant 0.000000e+00 : f32
    %56 = vector.broadcast %cst_23 : f32 to vector<16x128xf32>
    %57 = arith.select %52, %32, %56 : vector<16x128xi1>, vector<16x128xf32>
    %c0_24 = arith.constant 0 : index
    %c1_25 = arith.constant 1 : index
    %c0_26 = arith.constant 0 : index
    %c0_27 = arith.constant 0 : index
    %58 = vector.load %arg7[%c0_24, %c1_25, %c0_26, %c0_27] : memref<1x10x8x128xf32, #tpu.memory_space<vmem>>, vector<1x1x8x128xf32>
    %59 = vector.shape_cast %58 : vector<1x1x8x128xf32> to vector<8x128xf32>
    %60 = vector.extract_strided_slice %57 {offsets = [0, 0], sizes = [8, 128], strides = [1, 1]} : vector<16x128xf32> to vector<8x128xf32>
    %61 = vector.extract_strided_slice %57 {offsets = [8, 0], sizes = [8, 128], strides = [1, 1]} : vector<16x128xf32> to vector<8x128xf32>
    %62 = arith.addf %60, %61 : vector<8x128xf32>
    %63 = arith.addf %59, %62 : vector<8x128xf32>
    %c0_28 = arith.constant 0 : index
    %c1_29 = arith.constant 1 : index
    %c0_30 = arith.constant 0 : index
    %c0_31 = arith.constant 0 : index
    %64 = vector.load %arg7[%c0_28, %c1_29, %c0_30, %c0_31] : memref<1x10x8x128xf32, #tpu.memory_space<vmem>>, vector<1x1x8x128xf32>
    %65 = vector.shape_cast %64 : vector<1x1x8x128xf32> to vector<8x128xf32>
    %66 = vector.shape_cast %63 : vector<8x128xf32> to vector<1x1x8x128xf32>
    tpu.vector_store %arg7[%c0_28, %c1_29, %c0_30, %c0_31], %66 {strides = array<i32>} : memref<1x10x8x128xf32, #tpu.memory_space<vmem>>, vector<1x1x8x128xf32>,
    %cst_32 = arith.constant 2.000000e+00 : f32
    %67 = vector.broadcast %cst_32 : f32 to vector<16x128xf32>
    %68 = arith.cmpf oeq, %30, %67 : vector<16x128xf32>
    %c2 = arith.constant 2 : index
    %69 = memref.load %arg5[%c2] : memref<10xf32, #tpu.memory_space<smem>>
    %70 = vector.broadcast %69 : f32 to vector<16x128xf32>
    %71 = arith.select %68, %70, %55 : vector<16x128xi1>, vector<16x128xf32>
    %cst_33 = arith.constant 0.000000e+00 : f32
    %72 = vector.broadcast %cst_33 : f32 to vector<16x128xf32>
    %73 = arith.select %68, %32, %72 : vector<16x128xi1>, vector<16x128xf32>
    %c0_34 = arith.constant 0 : index
    %c2_35 = arith.constant 2 : index
    %c0_36 = arith.constant 0 : index
    %c0_37 = arith.constant 0 : index
    %74 = vector.load %arg7[%c0_34, %c2_35, %c0_36, %c0_37] : memref<1x10x8x128xf32, #tpu.memory_space<vmem>>, vector<1x1x8x128xf32>
    %75 = vector.shape_cast %74 : vector<1x1x8x128xf32> to vector<8x128xf32>
    %76 = vector.extract_strided_slice %73 {offsets = [0, 0], sizes = [8, 128], strides = [1, 1]} : vector<16x128xf32> to vector<8x128xf32>
    %77 = vector.extract_strided_slice %73 {offsets = [8, 0], sizes = [8, 128], strides = [1, 1]} : vector<16x128xf32> to vector<8x128xf32>
    %78 = arith.addf %76, %77 : vector<8x128xf32>
    %79 = arith.addf %75, %78 : vector<8x128xf32>
    %c0_38 = arith.constant 0 : index
    %c2_39 = arith.constant 2 : index
    %c0_40 = arith.constant 0 : index
    %c0_41 = arith.constant 0 : index
    %80 = vector.load %arg7[%c0_38, %c2_39, %c0_40, %c0_41] : memref<1x10x8x128xf32, #tpu.memory_space<vmem>>, vector<1x1x8x128xf32>
    %81 = vector.shape_cast %80 : vector<1x1x8x128xf32> to vector<8x128xf32>
    %82 = vector.shape_cast %79 : vector<8x128xf32> to vector<1x1x8x128xf32>
    tpu.vector_store %arg7[%c0_38, %c2_39, %c0_40, %c0_41], %82 {strides = array<i32>} : memref<1x10x8x128xf32, #tpu.memory_space<vmem>>, vector<1x1x8x128xf32>,
    %cst_42 = arith.constant 3.000000e+00 : f32
    %83 = vector.broadcast %cst_42 : f32 to vector<16x128xf32>
    %84 = arith.cmpf oeq, %30, %83 : vector<16x128xf32>
    %c3 = arith.constant 3 : index
    %85 = memref.load %arg5[%c3] : memref<10xf32, #tpu.memory_space<smem>>
    %86 = vector.broadcast %85 : f32 to vector<16x128xf32>
    %87 = arith.select %84, %86, %71 : vector<16x128xi1>, vector<16x128xf32>
    %cst_43 = arith.constant 0.000000e+00 : f32
    %88 = vector.broadcast %cst_43 : f32 to vector<16x128xf32>
    %89 = arith.select %84, %32, %88 : vector<16x128xi1>, vector<16x128xf32>
    %c0_44 = arith.constant 0 : index
    %c3_45 = arith.constant 3 : index
    %c0_46 = arith.constant 0 : index
    %c0_47 = arith.constant 0 : index
    %90 = vector.load %arg7[%c0_44, %c3_45, %c0_46, %c0_47] : memref<1x10x8x128xf32, #tpu.memory_space<vmem>>, vector<1x1x8x128xf32>
    %91 = vector.shape_cast %90 : vector<1x1x8x128xf32> to vector<8x128xf32>
    %92 = vector.extract_strided_slice %89 {offsets = [0, 0], sizes = [8, 128], strides = [1, 1]} : vector<16x128xf32> to vector<8x128xf32>
    %93 = vector.extract_strided_slice %89 {offsets = [8, 0], sizes = [8, 128], strides = [1, 1]} : vector<16x128xf32> to vector<8x128xf32>
    %94 = arith.addf %92, %93 : vector<8x128xf32>
    %95 = arith.addf %91, %94 : vector<8x128xf32>
    %c0_48 = arith.constant 0 : index
    %c3_49 = arith.constant 3 : index
    %c0_50 = arith.constant 0 : index
    %c0_51 = arith.constant 0 : index
    %96 = vector.load %arg7[%c0_48, %c3_49, %c0_50, %c0_51] : memref<1x10x8x128xf32, #tpu.memory_space<vmem>>, vector<1x1x8x128xf32>
    %97 = vector.shape_cast %96 : vector<1x1x8x128xf32> to vector<8x128xf32>
    %98 = vector.shape_cast %95 : vector<8x128xf32> to vector<1x1x8x128xf32>
    tpu.vector_store %arg7[%c0_48, %c3_49, %c0_50, %c0_51], %98 {strides = array<i32>} : memref<1x10x8x128xf32, #tpu.memory_space<vmem>>, vector<1x1x8x128xf32>,
    %cst_52 = arith.constant 4.000000e+00 : f32
    %99 = vector.broadcast %cst_52 : f32 to vector<16x128xf32>
    %100 = arith.cmpf oeq, %30, %99 : vector<16x128xf32>
    %c4 = arith.constant 4 : index
    %101 = memref.load %arg5[%c4] : memref<10xf32, #tpu.memory_space<smem>>
    %102 = vector.broadcast %101 : f32 to vector<16x128xf32>
    %103 = arith.select %100, %102, %87 : vector<16x128xi1>, vector<16x128xf32>
    %cst_53 = arith.constant 0.000000e+00 : f32
    %104 = vector.broadcast %cst_53 : f32 to vector<16x128xf32>
    %105 = arith.select %100, %32, %104 : vector<16x128xi1>, vector<16x128xf32>
    %c0_54 = arith.constant 0 : index
    %c4_55 = arith.constant 4 : index
    %c0_56 = arith.constant 0 : index
    %c0_57 = arith.constant 0 : index
    %106 = vector.load %arg7[%c0_54, %c4_55, %c0_56, %c0_57] : memref<1x10x8x128xf32, #tpu.memory_space<vmem>>, vector<1x1x8x128xf32>
    %107 = vector.shape_cast %106 : vector<1x1x8x128xf32> to vector<8x128xf32>
    %108 = vector.extract_strided_slice %105 {offsets = [0, 0], sizes = [8, 128], strides = [1, 1]} : vector<16x128xf32> to vector<8x128xf32>
    %109 = vector.extract_strided_slice %105 {offsets = [8, 0], sizes = [8, 128], strides = [1, 1]} : vector<16x128xf32> to vector<8x128xf32>
    %110 = arith.addf %108, %109 : vector<8x128xf32>
    %111 = arith.addf %107, %110 : vector<8x128xf32>
    %c0_58 = arith.constant 0 : index
    %c4_59 = arith.constant 4 : index
    %c0_60 = arith.constant 0 : index
    %c0_61 = arith.constant 0 : index
    %112 = vector.load %arg7[%c0_58, %c4_59, %c0_60, %c0_61] : memref<1x10x8x128xf32, #tpu.memory_space<vmem>>, vector<1x1x8x128xf32>
    %113 = vector.shape_cast %112 : vector<1x1x8x128xf32> to vector<8x128xf32>
    %114 = vector.shape_cast %111 : vector<8x128xf32> to vector<1x1x8x128xf32>
    tpu.vector_store %arg7[%c0_58, %c4_59, %c0_60, %c0_61], %114 {strides = array<i32>} : memref<1x10x8x128xf32, #tpu.memory_space<vmem>>, vector<1x1x8x128xf32>,
    %cst_62 = arith.constant 5.000000e+00 : f32
    %115 = vector.broadcast %cst_62 : f32 to vector<16x128xf32>
    %116 = arith.cmpf oeq, %30, %115 : vector<16x128xf32>
    %c5 = arith.constant 5 : index
    %117 = memref.load %arg5[%c5] : memref<10xf32, #tpu.memory_space<smem>>
    %118 = vector.broadcast %117 : f32 to vector<16x128xf32>
    %119 = arith.select %116, %118, %103 : vector<16x128xi1>, vector<16x128xf32>
    %cst_63 = arith.constant 0.000000e+00 : f32
    %120 = vector.broadcast %cst_63 : f32 to vector<16x128xf32>
    %121 = arith.select %116, %32, %120 : vector<16x128xi1>, vector<16x128xf32>
    %c0_64 = arith.constant 0 : index
    %c5_65 = arith.constant 5 : index
    %c0_66 = arith.constant 0 : index
    %c0_67 = arith.constant 0 : index
    %122 = vector.load %arg7[%c0_64, %c5_65, %c0_66, %c0_67] : memref<1x10x8x128xf32, #tpu.memory_space<vmem>>, vector<1x1x8x128xf32>
    %123 = vector.shape_cast %122 : vector<1x1x8x128xf32> to vector<8x128xf32>
    %124 = vector.extract_strided_slice %121 {offsets = [0, 0], sizes = [8, 128], strides = [1, 1]} : vector<16x128xf32> to vector<8x128xf32>
    %125 = vector.extract_strided_slice %121 {offsets = [8, 0], sizes = [8, 128], strides = [1, 1]} : vector<16x128xf32> to vector<8x128xf32>
    %126 = arith.addf %124, %125 : vector<8x128xf32>
    %127 = arith.addf %123, %126 : vector<8x128xf32>
    %c0_68 = arith.constant 0 : index
    %c5_69 = arith.constant 5 : index
    %c0_70 = arith.constant 0 : index
    %c0_71 = arith.constant 0 : index
    %128 = vector.load %arg7[%c0_68, %c5_69, %c0_70, %c0_71] : memref<1x10x8x128xf32, #tpu.memory_space<vmem>>, vector<1x1x8x128xf32>
    %129 = vector.shape_cast %128 : vector<1x1x8x128xf32> to vector<8x128xf32>
    %130 = vector.shape_cast %127 : vector<8x128xf32> to vector<1x1x8x128xf32>
    tpu.vector_store %arg7[%c0_68, %c5_69, %c0_70, %c0_71], %130 {strides = array<i32>} : memref<1x10x8x128xf32, #tpu.memory_space<vmem>>, vector<1x1x8x128xf32>,
    %cst_72 = arith.constant 6.000000e+00 : f32
    %131 = vector.broadcast %cst_72 : f32 to vector<16x128xf32>
    %132 = arith.cmpf oeq, %30, %131 : vector<16x128xf32>
    %c6 = arith.constant 6 : index
    %133 = memref.load %arg5[%c6] : memref<10xf32, #tpu.memory_space<smem>>
    %134 = vector.broadcast %133 : f32 to vector<16x128xf32>
    %135 = arith.select %132, %134, %119 : vector<16x128xi1>, vector<16x128xf32>
    %cst_73 = arith.constant 0.000000e+00 : f32
    %136 = vector.broadcast %cst_73 : f32 to vector<16x128xf32>
    %137 = arith.select %132, %32, %136 : vector<16x128xi1>, vector<16x128xf32>
    %c0_74 = arith.constant 0 : index
    %c6_75 = arith.constant 6 : index
    %c0_76 = arith.constant 0 : index
    %c0_77 = arith.constant 0 : index
    %138 = vector.load %arg7[%c0_74, %c6_75, %c0_76, %c0_77] : memref<1x10x8x128xf32, #tpu.memory_space<vmem>>, vector<1x1x8x128xf32>
    %139 = vector.shape_cast %138 : vector<1x1x8x128xf32> to vector<8x128xf32>
    %140 = vector.extract_strided_slice %137 {offsets = [0, 0], sizes = [8, 128], strides = [1, 1]} : vector<16x128xf32> to vector<8x128xf32>
    %141 = vector.extract_strided_slice %137 {offsets = [8, 0], sizes = [8, 128], strides = [1, 1]} : vector<16x128xf32> to vector<8x128xf32>
    %142 = arith.addf %140, %141 : vector<8x128xf32>
    %143 = arith.addf %139, %142 : vector<8x128xf32>
    %c0_78 = arith.constant 0 : index
    %c6_79 = arith.constant 6 : index
    %c0_80 = arith.constant 0 : index
    %c0_81 = arith.constant 0 : index
    %144 = vector.load %arg7[%c0_78, %c6_79, %c0_80, %c0_81] : memref<1x10x8x128xf32, #tpu.memory_space<vmem>>, vector<1x1x8x128xf32>
    %145 = vector.shape_cast %144 : vector<1x1x8x128xf32> to vector<8x128xf32>
    %146 = vector.shape_cast %143 : vector<8x128xf32> to vector<1x1x8x128xf32>
    tpu.vector_store %arg7[%c0_78, %c6_79, %c0_80, %c0_81], %146 {strides = array<i32>} : memref<1x10x8x128xf32, #tpu.memory_space<vmem>>, vector<1x1x8x128xf32>,
    %cst_82 = arith.constant 7.000000e+00 : f32
    %147 = vector.broadcast %cst_82 : f32 to vector<16x128xf32>
    %148 = arith.cmpf oeq, %30, %147 : vector<16x128xf32>
    %c7 = arith.constant 7 : index
    %149 = memref.load %arg5[%c7] : memref<10xf32, #tpu.memory_space<smem>>
    %150 = vector.broadcast %149 : f32 to vector<16x128xf32>
    %151 = arith.select %148, %150, %135 : vector<16x128xi1>, vector<16x128xf32>
    %cst_83 = arith.constant 0.000000e+00 : f32
    %152 = vector.broadcast %cst_83 : f32 to vector<16x128xf32>
    %153 = arith.select %148, %32, %152 : vector<16x128xi1>, vector<16x128xf32>
    %c0_84 = arith.constant 0 : index
    %c7_85 = arith.constant 7 : index
    %c0_86 = arith.constant 0 : index
    %c0_87 = arith.constant 0 : index
    %154 = vector.load %arg7[%c0_84, %c7_85, %c0_86, %c0_87] : memref<1x10x8x128xf32, #tpu.memory_space<vmem>>, vector<1x1x8x128xf32>
    %155 = vector.shape_cast %154 : vector<1x1x8x128xf32> to vector<8x128xf32>
    %156 = vector.extract_strided_slice %153 {offsets = [0, 0], sizes = [8, 128], strides = [1, 1]} : vector<16x128xf32> to vector<8x128xf32>
    %157 = vector.extract_strided_slice %153 {offsets = [8, 0], sizes = [8, 128], strides = [1, 1]} : vector<16x128xf32> to vector<8x128xf32>
    %158 = arith.addf %156, %157 : vector<8x128xf32>
    %159 = arith.addf %155, %158 : vector<8x128xf32>
    %c0_88 = arith.constant 0 : index
    %c7_89 = arith.constant 7 : index
    %c0_90 = arith.constant 0 : index
    %c0_91 = arith.constant 0 : index
    %160 = vector.load %arg7[%c0_88, %c7_89, %c0_90, %c0_91] : memref<1x10x8x128xf32, #tpu.memory_space<vmem>>, vector<1x1x8x128xf32>
    %161 = vector.shape_cast %160 : vector<1x1x8x128xf32> to vector<8x128xf32>
    %162 = vector.shape_cast %159 : vector<8x128xf32> to vector<1x1x8x128xf32>
    tpu.vector_store %arg7[%c0_88, %c7_89, %c0_90, %c0_91], %162 {strides = array<i32>} : memref<1x10x8x128xf32, #tpu.memory_space<vmem>>, vector<1x1x8x128xf32>,
    %cst_92 = arith.constant 8.000000e+00 : f32
    %163 = vector.broadcast %cst_92 : f32 to vector<16x128xf32>
    %164 = arith.cmpf oeq, %30, %163 : vector<16x128xf32>
    %c8 = arith.constant 8 : index
    %165 = memref.load %arg5[%c8] : memref<10xf32, #tpu.memory_space<smem>>
    %166 = vector.broadcast %165 : f32 to vector<16x128xf32>
    %167 = arith.select %164, %166, %151 : vector<16x128xi1>, vector<16x128xf32>
    %cst_93 = arith.constant 0.000000e+00 : f32
    %168 = vector.broadcast %cst_93 : f32 to vector<16x128xf32>
    %169 = arith.select %164, %32, %168 : vector<16x128xi1>, vector<16x128xf32>
    %c0_94 = arith.constant 0 : index
    %c8_95 = arith.constant 8 : index
    %c0_96 = arith.constant 0 : index
    %c0_97 = arith.constant 0 : index
    %170 = vector.load %arg7[%c0_94, %c8_95, %c0_96, %c0_97] : memref<1x10x8x128xf32, #tpu.memory_space<vmem>>, vector<1x1x8x128xf32>
    %171 = vector.shape_cast %170 : vector<1x1x8x128xf32> to vector<8x128xf32>
    %172 = vector.extract_strided_slice %169 {offsets = [0, 0], sizes = [8, 128], strides = [1, 1]} : vector<16x128xf32> to vector<8x128xf32>
    %173 = vector.extract_strided_slice %169 {offsets = [8, 0], sizes = [8, 128], strides = [1, 1]} : vector<16x128xf32> to vector<8x128xf32>
    %174 = arith.addf %172, %173 : vector<8x128xf32>
    %175 = arith.addf %171, %174 : vector<8x128xf32>
    %c0_98 = arith.constant 0 : index
    %c8_99 = arith.constant 8 : index
    %c0_100 = arith.constant 0 : index
    %c0_101 = arith.constant 0 : index
    %176 = vector.load %arg7[%c0_98, %c8_99, %c0_100, %c0_101] : memref<1x10x8x128xf32, #tpu.memory_space<vmem>>, vector<1x1x8x128xf32>
    %177 = vector.shape_cast %176 : vector<1x1x8x128xf32> to vector<8x128xf32>
    %178 = vector.shape_cast %175 : vector<8x128xf32> to vector<1x1x8x128xf32>
    tpu.vector_store %arg7[%c0_98, %c8_99, %c0_100, %c0_101], %178 {strides = array<i32>} : memref<1x10x8x128xf32, #tpu.memory_space<vmem>>, vector<1x1x8x128xf32>,
    %cst_102 = arith.constant 9.000000e+00 : f32
    %179 = vector.broadcast %cst_102 : f32 to vector<16x128xf32>
    %180 = arith.cmpf oeq, %30, %179 : vector<16x128xf32>
    %c9 = arith.constant 9 : index
    %181 = memref.load %arg5[%c9] : memref<10xf32, #tpu.memory_space<smem>>
    %182 = vector.broadcast %181 : f32 to vector<16x128xf32>
    %183 = arith.select %180, %182, %167 : vector<16x128xi1>, vector<16x128xf32>
    %cst_103 = arith.constant 0.000000e+00 : f32
    %184 = vector.broadcast %cst_103 : f32 to vector<16x128xf32>
    %185 = arith.select %180, %32, %184 : vector<16x128xi1>, vector<16x128xf32>
    %c0_104 = arith.constant 0 : index
    %c9_105 = arith.constant 9 : index
    %c0_106 = arith.constant 0 : index
    %c0_107 = arith.constant 0 : index
    %186 = vector.load %arg7[%c0_104, %c9_105, %c0_106, %c0_107] : memref<1x10x8x128xf32, #tpu.memory_space<vmem>>, vector<1x1x8x128xf32>
    %187 = vector.shape_cast %186 : vector<1x1x8x128xf32> to vector<8x128xf32>
    %188 = vector.extract_strided_slice %185 {offsets = [0, 0], sizes = [8, 128], strides = [1, 1]} : vector<16x128xf32> to vector<8x128xf32>
    %189 = vector.extract_strided_slice %185 {offsets = [8, 0], sizes = [8, 128], strides = [1, 1]} : vector<16x128xf32> to vector<8x128xf32>
    %190 = arith.addf %188, %189 : vector<8x128xf32>
    %191 = arith.addf %187, %190 : vector<8x128xf32>
    %c0_108 = arith.constant 0 : index
    %c9_109 = arith.constant 9 : index
    %c0_110 = arith.constant 0 : index
    %c0_111 = arith.constant 0 : index
    %192 = vector.load %arg7[%c0_108, %c9_109, %c0_110, %c0_111] : memref<1x10x8x128xf32, #tpu.memory_space<vmem>>, vector<1x1x8x128xf32>
    %193 = vector.shape_cast %192 : vector<1x1x8x128xf32> to vector<8x128xf32>
    %194 = vector.shape_cast %191 : vector<8x128xf32> to vector<1x1x8x128xf32>
    tpu.vector_store %arg7[%c0_108, %c9_109, %c0_110, %c0_111], %194 {strides = array<i32>} : memref<1x10x8x128xf32, #tpu.memory_space<vmem>>, vector<1x1x8x128xf32>,
    %c0_112 = arith.constant 0 : index
    %c0_113 = arith.constant 0 : index
    %c0_114 = arith.constant 0 : index
    %195 = vector.load %arg6[%c0_112, %c0_113, %c0_114] : memref<1x8x128xf32, #tpu.memory_space<vmem>>, vector<1x8x128xf32>
    %196 = vector.shape_cast %195 : vector<1x8x128xf32> to vector<8x128xf32>
    %197 = arith.mulf %33, %183 : vector<16x128xf32>
    %198 = vector.extract_strided_slice %197 {offsets = [0, 0], sizes = [8, 128], strides = [1, 1]} : vector<16x128xf32> to vector<8x128xf32>
    %199 = vector.extract_strided_slice %197 {offsets = [8, 0], sizes = [8, 128], strides = [1, 1]} : vector<16x128xf32> to vector<8x128xf32>
    %200 = arith.addf %198, %199 : vector<8x128xf32>
    %201 = arith.addf %196, %200 : vector<8x128xf32>
    %c0_115 = arith.constant 0 : index
    %c0_116 = arith.constant 0 : index
    %c0_117 = arith.constant 0 : index
    %202 = vector.load %arg6[%c0_115, %c0_116, %c0_117] : memref<1x8x128xf32, #tpu.memory_space<vmem>>, vector<1x8x128xf32>
    %203 = vector.shape_cast %202 : vector<1x8x128xf32> to vector<8x128xf32>
    %204 = vector.shape_cast %201 : vector<8x128xf32> to vector<1x8x128xf32>
    tpu.vector_store %arg6[%c0_115, %c0_116, %c0_117], %204 {strides = array<i32>} : memref<1x8x128xf32, #tpu.memory_space<vmem>>, vector<1x8x128xf32>,
    %c1_i32 = arith.constant 1 : i32
    return
  }
  func.func @transform_0(%arg0: i32, %arg1: i32) -> (i32, i32) {
    %c1_i32 = arith.constant 1 : i32
    %0 = arith.muli %arg0, %c1_i32 : i32
    %1 = arith.addi %0, %arg1 : i32
    %c0_i32 = arith.constant 0 : i32
    %c0_i32_0 = arith.constant 0 : i32
    return %1, %c0_i32 : i32, i32
  }
  func.func @transform_1(%arg0: i32, %arg1: i32) -> (i32, i32) {
    %c1_i32 = arith.constant 1 : i32
    %0 = arith.muli %arg0, %c1_i32 : i32
    %1 = arith.addi %0, %arg1 : i32
    %c0_i32 = arith.constant 0 : i32
    %c0_i32_0 = arith.constant 0 : i32
    return %1, %c0_i32 : i32, i32
  }
  func.func @transform_2(%arg0: i32, %arg1: i32) -> (i32, i32) {
    %c1_i32 = arith.constant 1 : i32
    %0 = arith.muli %arg0, %c1_i32 : i32
    %1 = arith.addi %0, %arg1 : i32
    %c0_i32 = arith.constant 0 : i32
    %c0_i32_0 = arith.constant 0 : i32
    return %1, %c0_i32 : i32, i32
  }
  func.func @transform_3(%arg0: i32, %arg1: i32) -> i32 {
    %c0_i32 = arith.constant 0 : i32
    %c0_i32_0 = arith.constant 0 : i32
    return %c0_i32 : i32
  }
  func.func @transform_4(%arg0: i32, %arg1: i32) -> (i32, i32, i32) {
    %c0_i32 = arith.constant 0 : i32
    %c0_i32_0 = arith.constant 0 : i32
    %c0_i32_1 = arith.constant 0 : i32
    return %arg0, %c0_i32, %c0_i32_0 : i32, i32, i32
  }
  func.func @transform_5(%arg0: i32, %arg1: i32) -> (i32, i32, i32, i32) {
    %c0_i32 = arith.constant 0 : i32
    %c0_i32_0 = arith.constant 0 : i32
    %c0_i32_1 = arith.constant 0 : i32
    %c0_i32_2 = arith.constant 0 : i32
    return %arg0, %c0_i32, %c0_i32_0, %c0_i32_1 : i32, i32, i32, i32
  }
}

</mosaic_0001>

<bundles_post_ra>
// kernel: tpu_custom_call.1
= control target key start
LH: loop header
LB: loop body
LE: loop exit
PB: predicated region body
PF: predicated region fallthrough
CT: control target
= control target key end

     0   :  { %11 = vsyncpa [#allocation3], 0  ;;  %s698_s0 = inlined_call_operand.hbm [shape: f32[16,128], index: 0, kind: input, shape index: {}]   ;;  %s699_s1 = inlined_call_operand.hbm [shape: f32[16,128], index: 1, kind: input, shape index: {}]   ;;  %s700_s2 = inlined_call_operand.hbm [shape: f32[16,128], index: 2, kind: input, shape index: {}]   ;;  %s701_s3 = inlined_call_operand.vmem [shape: f32[10], index: 3, kind: input, shape index: {}]   ;;  %s702_s4 = inlined_call_operand.hbm [shape: f32[1,8,128], index: 4, kind: output, shape index: {0}]   ;;  %s703_s5 = inlined_call_operand.hbm [shape: f32[1,10,8,128], index: 5, kind: output, shape index: {1}]  }
   0x1   :  { %12 = vsyncpa [#allocation7], 0 }
   0x2   :  { %13 = vsyncpa [#allocation5], 0 }
   0x3   :  { %14 = vsyncpa [#allocation4], 0 }
   0x4   :  { %15 = vsyncpa [#allocation12], 0  ;;  %s41_s20 = sshll.u32 %s699_s1, 4  ;;  %s496_s21 = smov [#allocation6]   ;;  %s42_s20 = int_to_ptr.hbm [resolvable:$true] %s41_s20 }
   0x5   :  { %s43_s22 = sshll.u32 %s496_s21, 4  ;;  %s24_s25 = sshll.u32 %s698_s0, 4  ;;  %s44_s22 = int_to_ptr.vmem [resolvable:$true] %s43_s22  ;;  %s25_s25 = int_to_ptr.hbm [resolvable:$true] %s24_s25 }
   0x6   :  { %s497_s26 = smov 128   ;;  %s498_s27 = smov 8  }
   0x7   :  { %49 = dma.hbm_to_vmem [thread:$0]  %s42_s20, 256, %s44_s22, [#allocation7], %s497_s26, %s497_s26, %s498_s27  }
   0x8   :  { %s499_s28 = smov [#allocation2]   ;;  %s58_s1 = sshll.u32 %s700_s2, 4  ;;  %s59_s1 = int_to_ptr.hbm [resolvable:$true] %s58_s1 }
   0x9   :  { %s26_s29 = sshll.u32 %s499_s28, 4  ;;  %s72_s8 = sshll.u32 %s701_s3, 4  ;;  %s27_s29 = int_to_ptr.vmem [resolvable:$true] %s26_s29  ;;  %s73_s8 = int_to_ptr.vmem [resolvable:$true] %s72_s8 }
   0xa   :  { %32 = dma.hbm_to_vmem [thread:$0]  %s25_s25, 256, %s27_s29, [#allocation3], %s497_s26, %s497_s26, %s498_s27  }
   0xb   :  { %s500_s9 = smov [#allocation8]   ;;  %s501_s11 = smov [#allocation9]  }
   0xc   :  { %s60_s10 = sshll.u32 %s500_s9, 4  ;;  %s61_s10 = int_to_ptr.vmem [resolvable:$true] %s60_s10 }
   0xd   :  { %66 = dma.hbm_to_vmem [thread:$0]  %s59_s1, 256, %s61_s10, [#allocation7], %s497_s26, %s497_s26, %s498_s27  }
   0xe   :  { %75 = dma.vmem_to_smem %s73_s8, 16, %s501_s11, [#allocation5]  }
   0xf   :  { %486 = dma.done.wait [#allocation3], 256  }
  0x10   :  { %487 = vsyncadd [#allocation3], 4294967040 }
  0x11   :  { %488 = dma.done.wait [#allocation7], 512  }
  0x12   :  { %489 = vsyncadd [#allocation7], 4294966784 }
  0x13   :  { %490 = dma.done.wait [#allocation5], 16  }
  0x14   :  { %491 = vsyncadd [#allocation5], 4294967280 }
  0x15   :  { %92 = sfence }
  0x16   :  { %v114_v0 = vld [vmem:[#allocation2] sm:$0xff]  ;;  %v115_v1 = vld [vmem:[#allocation2 + $0x8] sm:$0xff]  ;;  %v555_v2 = vld [vmem:[#allocation6] sm:$0xff]  ;;  %s557_s2 = sld [smem:[#allocation9]]  ;;  %s502_s20 = smov [#allocation11]  }
  0x17   :  { %v559_v3 = vld [vmem:[#allocation6 + $0x8] sm:$0xff]  ;;  %v142_v4 = vsub.f32 %v114_v0, %v555_v2  ;;  %s562_s3 = sld [smem:[#allocation9 + $0x1]]  ;;  %346 = vlog2.f32 %v114_v0  ;;  %v124_v7 = vsub.f32 1.0, %v114_v0  ;;  %v125_v9 = vsub.f32 1.0, %v115_v1  ;;  %v583_v24 = vld [vmem:[#allocation8] sm:$0xff]  ;;  %v585_v25 = vld [vmem:[#allocation8 + $0x8] sm:$0xff] }
  0x18   :  { %v143_v5 = vsub.f32 %v115_v1, %v559_v3  ;;  %s565_s12 = sld [smem:[#allocation9 + $0x2]]  ;;  %348 = vlog2.f32 %v115_v1  ;;  %v134_v15 = vsub.f32 1.0, %v555_v2  ;;  %s306_s21 = sshll.u32 %s502_s20, 4  ;;  %s307_s21 = int_to_ptr.vmem [resolvable:$true] %s306_s21 }
  0x19   :  { %v144_v6 = vand.u32 2147483647, %v142_v4  ;;  %s567_s13 = sld [smem:[#allocation9 + $0x3]]  ;;  %350 = vlog2.f32 %v124_v7  ;;  %s308_s24 = sshll.u32 %s703_s5, 4  ;;  %s309_s24 = int_to_ptr.hbm [resolvable:$true] %s308_s24 }
  0x1a   :  { %v145_v8 = vand.u32 2147483647, %v143_v5  ;;  %s569_s14 = sld [smem:[#allocation9 + $0x4]]  ;;  %352 = vlog2.f32 %v125_v9  ;;  %s503_s5 = smov [#allocation10]  }
  0x1b   :  { %v146_v10 = vmul.f32 10.0, %v144_v6  ;;  %s594_s15 = sld [smem:[#allocation9 + $0x5]]  ;;  %s296_s25 = sshll.u32 %s503_s5, 4  ;;  %s297_s25 = int_to_ptr.vmem [resolvable:$true] %s296_s25 }
  0x1c   :  { %v147_v11 = vmul.f32 10.0, %v145_v8  ;;  %v159_v17 = vstv %s557_s2  ;;  %s607_s16 = sld [smem:[#allocation9 + $0x6]]  ;;  %s298_s30 = sshll.u32 %s702_s4, 4  ;;  %s299_s30 = int_to_ptr.hbm [resolvable:$true] %s298_s30 }
  0x1d   :  { %v347_v12 = vpop.eup %346  ;;  %v148_v13 = vfloor.f32 %v146_v10  ;;  %v171_v18 = vstv %s562_s3  ;;  %s616_s17 = sld [smem:[#allocation9 + $0x7]] }
  0x1e   :  { %v149_v14 = vfloor.f32 %v147_v11  ;;  %v184_v19 = vstv %s565_s12  ;;  %v581_v23 = vmul.f32 0.6931472, %v347_v12  ;;  %v349_v26 = vpop.eup %348  ;;  %s635_s18 = sld [smem:[#allocation9 + $0x8]] }
  0x1f   :  { %v572_v16 = vmin.f32 %v148_v13, 9.0  ;;  %v197_v21 = vstv %s567_s13  ;;  %v351_v29 = vpop.eup %350  ;;  %v121_v50 = vmul.f32 0.6931472, %v349_v26  ;;  %s649_s19 = sld [smem:[#allocation9 + $0x9]]  ;;  %v135_v13 = vsub.f32 1.0, %v559_v3 }
  0x20   :  { %v577_v20 = vmin.f32 %v149_v14, 9.0  ;;  %v210_v22 = vstv %s569_s14  ;;  %v598_v34 = vpop.eup %352  ;;  %v122_v0 = vmax.f32 %v581_v23, -100.0  ;;  %v127_v1 = vmul.f32 0.6931472, %v351_v29 }
  0x21   :  { %vm156_vm0 = vcmp.eq.f32.partialorder %v572_v16, 0.0  ;;  %vm168_vm1 = vcmp.eq.f32.partialorder %v572_v16, 1.0  ;;  %vm181_vm2 = vcmp.eq.f32.partialorder %v572_v16, 2.0  ;;  %vm194_vm3 = vcmp.eq.f32.partialorder %v572_v16, 3.0 }
  0x22   :  { %vm157_vm4 = vcmp.eq.f32.partialorder %v577_v20, 0.0  ;;  %v160_v27 = vsel %vm156_vm0, %v159_v17, 0.0  ;;  %v162_v28 = vsel %vm156_vm0, %v583_v24, 0.0  ;;  %vm169_vm5 = vcmp.eq.f32.partialorder %v577_v20, 1.0 }
  0x23   :  { %v161_v30 = vsel %vm157_vm4, %v159_v17, 0.0  ;;  %v163_v31 = vsel %vm157_vm4, %v585_v25, 0.0  ;;  %v172_v32 = vsel %vm168_vm1, %v171_v18, %v160_v27  ;;  %v174_v33 = vsel %vm168_vm1, %v583_v24, 0.0 }
  0x24   :  { %v165_v35 = vadd.f32 %v163_v31, %v162_v28  ;;  %v173_v36 = vsel %vm169_vm5, %v171_v18, %v161_v30  ;;  %v175_v37 = vsel %vm169_vm5, %v585_v25, 0.0  ;;  %vm182_vm6 = vcmp.eq.f32.partialorder %v577_v20, 2.0 }
  0x25   :  { %v178_v38 = vadd.f32 %v175_v37, %v174_v33  ;;  %v185_v39 = vsel %vm181_vm2, %v184_v19, %v172_v32  ;;  %v186_v40 = vsel %vm182_vm6, %v184_v19, %v173_v36  ;;  %v187_v41 = vsel %vm181_vm2, %v583_v24, 0.0 }
  0x26   :  { %v188_v42 = vsel %vm182_vm6, %v585_v25, 0.0  ;;  %vm195_vm7 = vcmp.eq.f32.partialorder %v577_v20, 3.0  ;;  %v198_v43 = vsel %vm194_vm3, %v197_v21, %v185_v39  ;;  %v200_v46 = vsel %vm194_vm3, %v583_v24, 0.0  ;;  %167 = vst [vmem:[#allocation11] sm:$0xff] %v165_v35 }
  0x27   :  { %v191_v44 = vadd.f32 %v188_v42, %v187_v41  ;;  %v199_v45 = vsel %vm195_vm7, %v197_v21, %v186_v40  ;;  %v201_v47 = vsel %vm195_vm7, %v585_v25, 0.0  ;;  %vm207_vm8 = vcmp.eq.f32.partialorder %v572_v16, 4.0  ;;  %180 = vst [vmem:[#allocation11 + $0x8] sm:$0xff] %v178_v38 }
  0x28   :  { %vm208_vm9 = vcmp.eq.f32.partialorder %v577_v20, 4.0  ;;  %vm220_vm10 = vcmp.eq.f32.partialorder %v572_v16, 5.0  ;;  %v204_v48 = vadd.f32 %v201_v47, %v200_v46  ;;  %v211_v49 = vsel %vm207_vm8, %v210_v22, %v198_v43 }
  0x29   :  { %v212_v51 = vsel %vm208_vm9, %v210_v22, %v199_v45  ;;  %v213_v52 = vsel %vm207_vm8, %v583_v24, 0.0  ;;  %v214_v53 = vsel %vm208_vm9, %v585_v25, 0.0  ;;  %v223_v54 = vstv %s594_s15  ;;  %193 = vst [vmem:[#allocation11 + $0x10] sm:$0xff] %v191_v44 }
  0x2a   :  { %v217_v55 = vadd.f32 %v214_v53, %v213_v52  ;;  %vm221_vm11 = vcmp.eq.f32.partialorder %v577_v20, 5.0  ;;  %v224_v56 = vsel %vm220_vm10, %v223_v54, %v211_v49  ;;  %v226_v57 = vsel %vm220_vm10, %v583_v24, 0.0  ;;  %206 = vst [vmem:[#allocation11 + $0x18] sm:$0xff] %v204_v48 }
  0x2b   :  { %v227_v58 = vsel %vm221_vm11, %v585_v25, 0.0  ;;  %vm233_vm12 = vcmp.eq.f32.partialorder %v572_v16, 6.0  ;;  %vm234_vm13 = vcmp.eq.f32.partialorder %v577_v20, 6.0  ;;  %v236_v60 = vstv %s607_s16 }
  0x2c   :  { %v230_v59 = vadd.f32 %v227_v58, %v226_v57  ;;  %v239_v61 = vsel %vm233_vm12, %v583_v24, 0.0  ;;  %v225_v62 = vsel %vm221_vm11, %v223_v54, %v212_v51  ;;  %v240_v63 = vsel %vm234_vm13, %v585_v25, 0.0  ;;  %219 = vst [vmem:[#allocation11 + $0x20] sm:$0xff] %v217_v55 }
  0x2d   :  { %v243_v4 = vadd.f32 %v240_v63, %v239_v61  ;;  %vm246_vm14 = vcmp.eq.f32.partialorder %v572_v16, 7.0  ;;  %vm247_vm15 = vcmp.eq.f32.partialorder %v577_v20, 7.0  ;;  %v237_v5 = vsel %vm233_vm12, %v236_v60, %v224_v56 }
  0x2e   :  { %v249_v6 = vstv %s616_s17  ;;  %v252_v7 = vsel %vm246_vm14, %v583_v24, 0.0  ;;  %v253_v8 = vsel %vm247_vm15, %v585_v25, 0.0  ;;  %232 = vst [vmem:[#allocation11 + $0x28] sm:$0xff] %v230_v59  ;;  %vm259_vm0 = vcmp.eq.f32.partialorder %v572_v16, 8.0 }
  0x2f   :  { %v256_v9 = vadd.f32 %v253_v8, %v252_v7  ;;  %vm260_vm1 = vcmp.eq.f32.partialorder %v577_v20, 8.0  ;;  %v238_v10 = vsel %vm234_vm13, %v236_v60, %v225_v62  ;;  %v265_v11 = vsel %vm259_vm0, %v583_v24, 0.0  ;;  %245 = vst [vmem:[#allocation11 + $0x30] sm:$0xff] %v243_v4 }
  0x30   :  { %v266_v12 = vsel %vm260_vm1, %v585_v25, 0.0  ;;  %v250_v14 = vsel %vm246_vm14, %v249_v6, %v237_v5  ;;  %vm272_vm2 = vcmp.eq.f32.partialorder %v572_v16, 9.0  ;;  %vm273_vm3 = vcmp.eq.f32.partialorder %v577_v20, 9.0 }
  0x31   :  { %v269_v17 = vadd.f32 %v266_v12, %v265_v11  ;;  %v278_v18 = vsel %vm272_vm2, %v583_v24, 0.0  ;;  %v123_v19 = vmax.f32 %v121_v50, -100.0  ;;  %v129_v21 = vmul.f32 0.6931472, %v598_v34  ;;  %258 = vst [vmem:[#allocation11 + $0x38] sm:$0xff] %v256_v9 }
  0x32   :  { %v279_v22 = vsel %vm273_vm3, %v585_v25, 0.0  ;;  %v130_v23 = vmax.f32 %v127_v1, -100.0  ;;  %v132_v26 = vmul.f32 %v122_v0, %v555_v2  ;;  %v262_v27 = vstv %s635_s18 }
  0x33   :  { %v282_v28 = vadd.f32 %v279_v22, %v278_v18  ;;  %v131_v29 = vmax.f32 %v129_v21, -100.0  ;;  %v133_v30 = vmul.f32 %v123_v19, %v559_v3  ;;  %v251_v31 = vsel %vm247_vm15, %v249_v6, %v238_v10  ;;  %271 = vst [vmem:[#allocation11 + $0x40] sm:$0xff] %v269_v17 }
  0x34   :  { %v136_v32 = vmul.f32 %v134_v15, %v130_v23  ;;  %v263_v34 = vsel %vm259_vm0, %v262_v27, %v250_v14  ;;  %v275_v36 = vstv %s649_s19  ;;  %v264_v37 = vsel %vm260_vm1, %v262_v27, %v251_v31 }
  0x35   :  { %v137_v33 = vmul.f32 %v135_v13, %v131_v29  ;;  %284 = vst [vmem:[#allocation11 + $0x48] sm:$0xff] %v282_v28  ;;  %v276_v15 = vsel %vm272_vm2, %v275_v36, %v263_v34  ;;  %v277_v40 = vsel %vm273_vm3, %v275_v36, %v264_v37 }
  0x36   :  { %v138_v35 = vadd.f32 %v136_v32, %v132_v26  ;;  %314 = dma.vmem_to_hbm [thread:$0]  %s307_s21, 1280, %s309_s24, [#allocation12], %s497_s26, %s497_s26, %s498_s27  }
  0x37   :  { %v139_v3 = vadd.f32 %v137_v33, %v133_v30 }
  0x38   :  { %v140_v38 = vsub.f32 0.0, %v138_v35 }
  0x39   :  { %v141_v2 = vsub.f32 0.0, %v139_v3 }
  0x3a   :  { %v154_v39 = vmul.f32 %v583_v24, %v140_v38 }
  0x3b   :  { %v155_v41 = vmul.f32 %v585_v25, %v141_v2 }
  0x3c   :  { %v286_v42 = vmul.f32 %v276_v15, %v154_v39 }
  0x3d   :  { %v287_v43 = vmul.f32 %v277_v40, %v155_v41 }
  0x3f   :  { %v288_v44 = vadd.f32 %v287_v43, %v286_v42 }
  0x41   :  { %290 = vst [vmem:[#allocation10] sm:$0xff] %v288_v44 }
  0x42   :  { %301 = dma.vmem_to_hbm [thread:$0]  %s297_s25, 128, %s299_s30, [#allocation4]  }
  0x43   :  { %492 = dma.done.wait [#allocation4], 128  }
  0x44   :  { %493 = vsyncadd [#allocation4], 4294967168 }
  0x45   :  { %494 = dma.done.wait [#allocation12], 1280  }
  0x46   :  { %495 = vsyncadd [#allocation12], 4294966016 }
  0x47   :  { %323 = vsyncpa [#allocation3], 1 }
  0x48   :  { %324 = vsyncpa [#allocation7], 1 }
  0x49   :  { %325 = vsyncpa [#allocation4], 1 }
  0x4a   :  { %326 = vsyncpa [#allocation12], 1 }
  0x4b   :  { %327 = vsyncpa [#allocation5], 1 }

</bundles_post_ra>
